<compile_context>
chip_gen: v7x
topology: tpu7x:2x2x1
jax: 0.10.0
libtpu: 0.0.40
codegen_flags: <defaults>
</compile_context>

<pallas_src>
import jax
import jax.numpy as jnp
from jax.experimental import pallas as pl
from jax.experimental.pallas import tpu as pltpu


# ----------------------------------------------------------------------------
# Hardware-aware sizing helpers.
# ----------------------------------------------------------------------------
def _vmem_caps():
    """(budget for our buffers, vmem_limit_bytes) — per TPU generation."""
    cap = 64 * 1024 * 1024                       # conservative default (v7x per-TC)
    try:
        cap = int(getattr(pltpu.get_tpu_info(), "vmem_capacity_bytes", cap))
    except Exception:
        pass
    budget = int(cap * 0.45)                     # our (double-buffered) working set
    limit = int(cap * 0.90)                      # scoped-VMEM limit handed to Mosaic
    return budget, limit


def _pick_batch_tile(B, cap=128):
    """Largest multiple-of-8 divisor of B that is <= cap, else whole B."""
    if B <= cap:
        return B
    for tb in range(cap, 7, -8):
        if B % tb == 0:
            return tb
    return B


def _pick_lane_tile(L, F, tb, itemsize, budget):
    """Largest 128-aligned divisor of L whose x-tile + w-tile footprint fits."""
    for tk in (2048, 1024, 512, 256, 128):
        if L % tk:
            continue
        foot = 2 * (tb * tk + tk * F) * itemsize + (2 * (tb * F + F) + tb * F) * 4
        if foot <= budget:
            return tk
    return 128


# ----------------------------------------------------------------------------
# Primary path: one pallas_call, static unroll over masks inside the kernel.
# x tile (tb, M*L) x weights (M, L, F)  ->  one lane-dense (tb, M*F) store.
# ----------------------------------------------------------------------------
def _fused_kernel(x_ref, w_ref, b_ref, o_ref):
    M, L, F = w_ref.shape
    outs = []
    for m in range(M):                      # static unroll; M is small on this path
        outs.append(jnp.dot(x_ref[:, m * L:(m + 1) * L], w_ref[m],
                            preferred_element_type=jnp.float32))
    o_ref[...] = (jnp.concatenate(outs, axis=-1) + b_ref[...]).astype(o_ref.dtype)


def _forward_fused(x2d, w_lf, b_flat, B, M, L, F, tb, out_dtype, vmem_limit):
    nb = B // tb
    return pl.pallas_call(
        _fused_kernel,
        out_shape=jax.ShapeDtypeStruct((B, M * F), out_dtype),
        grid=(nb,),
        in_specs=[
            pl.BlockSpec((tb, M * L), lambda i: (i, 0)),
            pl.BlockSpec((M, L, F), lambda i: (0, 0, 0)),    # resident, DMA'd once
            pl.BlockSpec((1, M * F), lambda i: (0, 0)),
        ],
        out_specs=pl.BlockSpec((tb, M * F), lambda i: (i, 0)),
        compiler_params=pltpu.CompilerParams(
            dimension_semantics=("parallel",),
            vmem_limit_bytes=vmem_limit,
        ),
    )(x2d, w_lf, b_flat)


# ----------------------------------------------------------------------------
# Large-shape path: grid=(M, B/tb, L/tk), L-reduction last ("arbitrary"),
# f32 VMEM accumulator.  x stays in its natural (B, M*L) layout; the per-mask
# L-chunk is picked on the lane axis by the index_map (no HBM transpose of x).
# ----------------------------------------------------------------------------
def _grid_kernel(x_ref, w_ref, b_ref, o_ref, acc_ref):
    k = pl.program_id(2)

    @pl.when(k == 0)
    def _():
        acc_ref[...] = jnp.zeros_like(acc_ref)

    acc_ref[...] += jnp.dot(x_ref[...], w_ref[0],
                            preferred_element_type=jnp.float32)

    @pl.when(k == pl.num_programs(2) - 1)
    def _():
        o_ref[0] = (acc_ref[...] + b_ref[0]).astype(o_ref.dtype)


def _forward_grid(x2d, w_lf, b_r, B, M, L, F, out_dtype, budget, vmem_limit):
    itemsize = jnp.dtype(x2d.dtype).itemsize
    tb = _pick_batch_tile(B)
    tk = _pick_lane_tile(L, F, tb, itemsize, budget)
    nb, nk = B // tb, L // tk
    # TODO(synk): also tile F for extremely large n_features (the (tk, F) weight
    # tile is assumed to fit VMEM here).
    out_mbf = pl.pallas_call(
        _grid_kernel,
        out_shape=jax.ShapeDtypeStruct((M, B, F), out_dtype),
        grid=(M, nb, nk),
        in_specs=[
            pl.BlockSpec((tb, tk), lambda m, b, k: (b, m * nk + k)),
            pl.BlockSpec((1, tk, F), lambda m, b, k: (m, k, 0)),
            pl.BlockSpec((1, 1, F), lambda m, b, k: (m, 0, 0)),
        ],
        out_specs=pl.BlockSpec((1, tb, F), lambda m, b, k: (m, b, 0)),
        scratch_shapes=[pltpu.VMEM((tb, F), jnp.float32)],
        compiler_params=pltpu.CompilerParams(
            dimension_semantics=("parallel", "parallel", "arbitrary"),
            vmem_limit_bytes=vmem_limit,
        ),
    )(x2d, w_lf, b_r)
    # Small (M*B*F) transpose in XLA; the big tensors were never transposed.
    return out_mbf.transpose(1, 0, 2)


# ----------------------------------------------------------------------------
# Last-resort path (huge shapes with L not a multiple of 128): pays one HBM
# transpose of x so each mask's chunk is a legal (B, L) block.
# ----------------------------------------------------------------------------
def _per_mask_kernel(x_ref, w_ref, b_ref, o_ref):
    y = jnp.dot(x_ref[0], w_ref[0], preferred_element_type=jnp.float32)
    o_ref[0] = (y + b_ref[0]).astype(o_ref.dtype)


def _forward_transpose_fallback(x2d, w_lf, b_r, B, M, L, F, out_dtype, vmem_limit):
    x_mbl = x2d.reshape(B, M, L).transpose(1, 0, 2)
    out = pl.pallas_call(
        _per_mask_kernel,
        out_shape=jax.ShapeDtypeStruct((M, B, F), out_dtype),
        grid=(M,),
        in_specs=[
            pl.BlockSpec((1, B, L), lambda m: (m, 0, 0)),
            pl.BlockSpec((1, L, F), lambda m: (m, 0, 0)),
            pl.BlockSpec((1, 1, F), lambda m: (m, 0, 0)),
        ],
        out_specs=pl.BlockSpec((1, B, F), lambda m: (m, 0, 0)),
        compiler_params=pltpu.CompilerParams(
            dimension_semantics=("parallel",),
            vmem_limit_bytes=vmem_limit,
        ),
    )(x_mbl, w_lf, b_r)
    return out.transpose(1, 0, 2)


# ----------------------------------------------------------------------------
# Public API (matches masked_reduction_layer.forward with top_k=None).
# ----------------------------------------------------------------------------
def prepare_masked_reduction_params(masks, weights, compute_dtype=None):
    """One-time parameter prep (hoist out of the per-call path / do at init):
    fold the mask into the weight ((x*m) @ W^T == x @ (m*W)^T) and transpose
    to MXU-friendly (M, L, F) layout.  Optionally cast to bf16 for v6e/v7x."""
    M, H, W = masks.shape
    L = H * W
    w_lf = weights.transpose(0, 2, 1) * masks.reshape(M, L, 1)        # (M, L, F)
    if compute_dtype is not None:
        w_lf = w_lf.astype(compute_dtype)
    return w_lf


def masked_reduction_apply(x, w_lf, biases, *, compute_dtype=None, force_grid=False):
    """
    x:      (B, M, H, W)
    w_lf:   (M, L, F)  prepared (mask-folded, transposed) weights
    biases: (M, F)
    returns (B, M, F) in x.dtype
    """
    B, M, H, W = x.shape
    L = H * W
    F = w_lf.shape[-1]
    out_dtype = x.dtype

    x2d = x.reshape(B, M * L)                  # pure reshape, no HBM transpose
    if compute_dtype is not None:
        x2d = x2d.astype(compute_dtype)
    itemsize = jnp.dtype(x2d.dtype).itemsize

    budget, vmem_limit = _vmem_caps()
    tb = _pick_batch_tile(B)

    # Fused-path footprint, modeling 2x pipeline double-buffering (bias/out f32).
    fused_bytes = (2 * (tb * M * L + M * L * F) * itemsize
                   + 2 * (tb * M * F + M * F) * 4)
    if not force_grid and M <= 64 and fused_bytes <= budget:
        out2d = _forward_fused(x2d, w_lf, biases.reshape(1, M * F),
                               B, M, L, F, tb, out_dtype, vmem_limit)
        return out2d.reshape(B, M, F)          # pure reshape

    b_r = biases.reshape(M, 1, F)
    if L % 128 == 0:
        return _forward_grid(x2d, w_lf, b_r, B, M, L, F, out_dtype,
                             budget, vmem_limit)
    return _forward_transpose_fallback(x2d, w_lf, b_r, B, M, L, F,
                                       out_dtype, vmem_limit)


def masked_reduction_forward(x, masks, weights, biases, *, compute_dtype=None,
                             force_grid=False):
    """Convenience wrapper: prep + apply.  For repeated calls, call
    prepare_masked_reduction_params() once and reuse w_lf."""
    w_lf = prepare_masked_reduction_params(masks, weights, compute_dtype)
    return masked_reduction_apply(x, w_lf, biases, compute_dtype=compute_dtype,
                                  force_grid=force_grid)


if __name__ == "__main__":
    # Shapes implied by the module: batch=2, n_masks=4, spatial 16x16, n_features=32.
    B, M, H, W, F = 2, 4, 16, 16, 32
    L = H * W

    key = jax.random.PRNGKey(0)
    k_x, k_m, k_w, k_b = jax.random.split(key, 4)

    x = jax.random.normal(k_x, (B, M, H, W), dtype=jnp.float32)
    masks = jax.random.bernoulli(k_m, p=0.5, shape=(M, H, W)).astype(jnp.float32)
    bound = 1.0 / jnp.sqrt(jnp.float32(L))
    weights = jax.random.uniform(k_w, (M, F, L), minval=-bound, maxval=bound,
                                 dtype=jnp.float32)
    biases = jax.random.uniform(k_b, (M, F), minval=-bound, maxval=bound,
                                dtype=jnp.float32)

    # TODO(synk): the top_k branch (torch.topk along the flattened spatial axis)
    # is not implemented; this covers the default top_k=None path.

    # Pure-JAX reference.
    xm = (x * masks[None]).reshape(B, M, L)
    ref = jnp.einsum("bml,mfl->bmf", xm, weights) + biases[None]

    # Prep once (hoisted weight fold/transpose), then apply.
    w_lf = prepare_masked_reduction_params(masks, weights)

    # Primary fused path (single pallas_call, in-kernel loop over masks).
    out = jax.block_until_ready(masked_reduction_apply(x, w_lf, biases))
    assert out.shape == (B, M, F)
    assert jnp.allclose(out, ref, atol=2e-5, rtol=1e-5)

    # Tiled grid path (the large-shape route), forced for coverage.
    out_grid = jax.block_until_ready(
        masked_reduction_apply(x, w_lf, biases, force_grid=True))
    assert jnp.allclose(out_grid, ref, atol=2e-5, rtol=1e-5)

    # bf16-operand path (v6e/v7x MXU-friendly): f32 accumulate/bias/output,
    # loosened tolerance for bf16 operand rounding.
    out_bf16 = jax.block_until_ready(
        masked_reduction_forward(x, masks, weights, biases,
                                 compute_dtype=jnp.bfloat16))
    assert jnp.allclose(out_bf16, ref, atol=5e-2, rtol=5e-2)

    print("KERNEL_OK")
</pallas_src>

<mosaic_0001>
module attributes {stable_mosaic.version = 11 : i64} {
  func.func @_fused_kernel(%arg0: i32, %arg1: memref<2x1024xf32, #tpu.memory_space<vmem>>, %arg2: memref<4x256x32xf32, #tpu.memory_space<vmem>>, %arg3: memref<1x128xf32, #tpu.memory_space<vmem>>, %arg4: memref<2x128xf32, #tpu.memory_space<vmem>>) attributes {dimension_semantics = [#tpu.dimension_semantics<parallel>], iteration_bounds = array<i64: 1>, scalar_prefetch = 0 : i64, scratch_operands = 0 : i64, tpu.core_type = #tpu.core_type<tc>, window_params = [{transform_indices = @transform_0, window_bounds = array<i64: 2, 1024>}, {pipeline_mode = #tpu.pipeline_mode<synchronous>, transform_indices = @transform_1, window_bounds = array<i64: 4, 256, 32>}, {pipeline_mode = #tpu.pipeline_mode<synchronous>, transform_indices = @transform_2, window_bounds = array<i64: 1, 128>}, {transform_indices = @transform_3, window_bounds = array<i64: 2, 128>}]} {
    %c0 = arith.constant 0 : index
    %c0_0 = arith.constant 0 : index
    %0 = vector.load %arg1[%c0, %c0_0] : memref<2x1024xf32, #tpu.memory_space<vmem>>, vector<2x256xf32>
    %c0_1 = arith.constant 0 : index
    %c0_2 = arith.constant 0 : index
    %c0_3 = arith.constant 0 : index
    %1 = vector.load %arg2[%c0_1, %c0_2, %c0_3] : memref<4x256x32xf32, #tpu.memory_space<vmem>>, vector<1x256x32xf32>
    %2 = vector.shape_cast %1 : vector<1x256x32xf32> to vector<256x32xf32>
    %cst = arith.constant dense<0.000000e+00> : vector<2x32xf32>
    %3 = tpu.matmul %0, %2, %cst {dimension_numbers = #tpu.dot_dimension_numbers<[1], [0], [0], [1], [0, 0, 1, 1], [], []>} : vector<2x256xf32>, vector<256x32xf32>, vector<2x32xf32> -> vector<2x32xf32>
    %c0_4 = arith.constant 0 : index
    %c256 = arith.constant 256 : index
    %4 = vector.load %arg1[%c0_4, %c256] : memref<2x1024xf32, #tpu.memory_space<vmem>>, vector<2x256xf32>
    %c1 = arith.constant 1 : index
    %c0_5 = arith.constant 0 : index
    %c0_6 = arith.constant 0 : index
    %5 = vector.load %arg2[%c1, %c0_5, %c0_6] : memref<4x256x32xf32, #tpu.memory_space<vmem>>, vector<1x256x32xf32>
    %6 = vector.shape_cast %5 : vector<1x256x32xf32> to vector<256x32xf32>
    %cst_7 = arith.constant dense<0.000000e+00> : vector<2x32xf32>
    %7 = tpu.matmul %4, %6, %cst_7 {dimension_numbers = #tpu.dot_dimension_numbers<[1], [0], [0], [1], [0, 0, 1, 1], [], []>} : vector<2x256xf32>, vector<256x32xf32>, vector<2x32xf32> -> vector<2x32xf32>
    %c0_8 = arith.constant 0 : index
    %c512 = arith.constant 512 : index
    %8 = vector.load %arg1[%c0_8, %c512] : memref<2x1024xf32, #tpu.memory_space<vmem>>, vector<2x256xf32>
    %c2 = arith.constant 2 : index
    %c0_9 = arith.constant 0 : index
    %c0_10 = arith.constant 0 : index
    %9 = vector.load %arg2[%c2, %c0_9, %c0_10] : memref<4x256x32xf32, #tpu.memory_space<vmem>>, vector<1x256x32xf32>
    %10 = vector.shape_cast %9 : vector<1x256x32xf32> to vector<256x32xf32>
    %cst_11 = arith.constant dense<0.000000e+00> : vector<2x32xf32>
    %11 = tpu.matmul %8, %10, %cst_11 {dimension_numbers = #tpu.dot_dimension_numbers<[1], [0], [0], [1], [0, 0, 1, 1], [], []>} : vector<2x256xf32>, vector<256x32xf32>, vector<2x32xf32> -> vector<2x32xf32>
    %c0_12 = arith.constant 0 : index
    %c768 = arith.constant 768 : index
    %12 = vector.load %arg1[%c0_12, %c768] : memref<2x1024xf32, #tpu.memory_space<vmem>>, vector<2x256xf32>
    %c3 = arith.constant 3 : index
    %c0_13 = arith.constant 0 : index
    %c0_14 = arith.constant 0 : index
    %13 = vector.load %arg2[%c3, %c0_13, %c0_14] : memref<4x256x32xf32, #tpu.memory_space<vmem>>, vector<1x256x32xf32>
    %14 = vector.shape_cast %13 : vector<1x256x32xf32> to vector<256x32xf32>
    %cst_15 = arith.constant dense<0.000000e+00> : vector<2x32xf32>
    %15 = tpu.matmul %12, %14, %cst_15 {dimension_numbers = #tpu.dot_dimension_numbers<[1], [0], [0], [1], [0, 0, 1, 1], [], []>} : vector<2x256xf32>, vector<256x32xf32>, vector<2x32xf32> -> vector<2x32xf32>
    %16 = tpu.concatenate %3, %7, %11, %15 in 1 : vector<2x32xf32>, vector<2x32xf32>, vector<2x32xf32>, vector<2x32xf32> -> vector<2x128xf32>
    %c0_16 = arith.constant 0 : index
    %c0_17 = arith.constant 0 : index
    %17 = vector.load %arg3[%c0_16, %c0_17] : memref<1x128xf32, #tpu.memory_space<vmem>>, vector<1x128xf32>
    %18 = vector.broadcast %17 : vector<1x128xf32> to vector<2x128xf32>
    %19 = arith.addf %16, %18 : vector<2x128xf32>
    %c0_18 = arith.constant 0 : index
    %c0_19 = arith.constant 0 : index
    %20 = vector.load %arg4[%c0_18, %c0_19] : memref<2x128xf32, #tpu.memory_space<vmem>>, vector<2x128xf32>
    tpu.vector_store %arg4[%c0_18, %c0_19], %19 {strides = array<i32>} : memref<2x128xf32, #tpu.memory_space<vmem>>, vector<2x128xf32>,
    return
  }
  func.func @transform_0(%arg0: i32) -> (i32, i32) {
    %c0_i32 = arith.constant 0 : i32
    %c0_i32_0 = arith.constant 0 : i32
    return %arg0, %c0_i32 : i32, i32
  }
  func.func @transform_1(%arg0: i32) -> (i32, i32, i32) {
    %c0_i32 = arith.constant 0 : i32
    %c0_i32_0 = arith.constant 0 : i32
    %c0_i32_1 = arith.constant 0 : i32
    %c0_i32_2 = arith.constant 0 : i32
    return %c0_i32, %c0_i32_0, %c0_i32_1 : i32, i32, i32
  }
  func.func @transform_2(%arg0: i32) -> (i32, i32) {
    %c0_i32 = arith.constant 0 : i32
    %c0_i32_0 = arith.constant 0 : i32
    %c0_i32_1 = arith.constant 0 : i32
    return %c0_i32, %c0_i32_0 : i32, i32
  }
  func.func @transform_3(%arg0: i32) -> (i32, i32) {
    %c0_i32 = arith.constant 0 : i32
    %c0_i32_0 = arith.constant 0 : i32
    return %arg0, %c0_i32 : i32, i32
  }
}

</mosaic_0001>

<bundles_post_ra>
// kernel: tpu_custom_call.1
= control target key start
LH: loop header
LB: loop body
LE: loop exit
PB: predicated region body
PF: predicated region fallthrough
CT: control target
= control target key end

     0   :  { %s1357_s0 = inlined_call_operand.vmem [shape: f32[2,1024], index: 0, kind: input, shape index: {}]   ;;  %s1358_s1 = inlined_call_operand.vmem [shape: f32[4,256,32], index: 1, kind: input, shape index: {}]   ;;  %s1359_s2 = inlined_call_operand.vmem [shape: f32[1,128], index: 2, kind: input, shape index: {}]   ;;  %s1360_s3 = inlined_call_operand.hbm [shape: f32[2,128], index: 3, kind: output, shape index: {}]  }
   0x1   :  { %v32_v0 = vld [vmem:[%s1358_s1 + $0x80] sm:$0xff]  ;;  %v33_v1 = vld [vmem:[%s1358_s1 + $0x88] sm:$0xff]  ;;  %v34_v11 = vld [vmem:[%s1358_s1 + $0x90] sm:$0xff] }
   0x2   :  { %v532_v2 = vld [vmem:[%s1358_s1 + $0x180] sm:$0xff]  ;;  %v756_v3 = vpack.c.bf16 %v33_v1, %v32_v0  ;;  %v533_v4 = vld [vmem:[%s1358_s1 + $0x188] sm:$0xff]  ;;  %v35_v13 = vld [vmem:[%s1358_s1 + $0x98] sm:$0xff] }
   0x3   :  { %v16_v5 = vld [vmem:[%s1358_s1] sm:$0xff]  ;;  %v17_v6 = vld [vmem:[%s1358_s1 + $0x8] sm:$0xff]  ;;  %v788_v7 = vpack.c.bf16 %v533_v4, %v532_v2  ;;  %v534_v14 = vld [vmem:[%s1358_s1 + $0x190] sm:$0xff]  ;;  %v760_v16 = vpack.c.bf16 %v35_v13, %v34_v11 }
   0x4   :  { %v758_v8 = vpack.c.bf16 %v17_v6, %v16_v5  ;;  %v516_v9 = vld [vmem:[%s1358_s1 + $0x100] sm:$0xff]  ;;  %v517_v10 = vld [vmem:[%s1358_s1 + $0x108] sm:$0xff]  ;;  %757 = vmatprep.subr.bf16.mxu0 %v756_v3  ;;  %v535_v15 = vld [vmem:[%s1358_s1 + $0x198] sm:$0xff] }
   0x5   :  { %v790_v12 = vpack.c.bf16 %v517_v10, %v516_v9  ;;  %789 = vmatprep.subr.bf16.mxu1 %v788_v7  ;;  %v792_v17 = vpack.c.bf16 %v535_v15, %v534_v14  ;;  %v18_v18 = vld [vmem:[%s1358_s1 + $0x10] sm:$0xff]  ;;  %v19_v19 = vld [vmem:[%s1358_s1 + $0x18] sm:$0xff]  ;;  %v36_v23 = vld [vmem:[%s1358_s1 + $0xa0] sm:$0xff] }
   0x6   :  { %759 = vmatpush3.bf16.msra.mxu0 %v758_v8  ;;  %v518_v20 = vld [vmem:[%s1358_s1 + $0x110] sm:$0xff]  ;;  %v762_v21 = vpack.c.bf16 %v19_v19, %v18_v18  ;;  %v519_v22 = vld [vmem:[%s1358_s1 + $0x118] sm:$0xff]  ;;  %v37_v24 = vld [vmem:[%s1358_s1 + $0xa8] sm:$0xff] }
   0x7   :  { %791 = vmatpush3.bf16.msra.mxu1 %v790_v12  ;;  %761 = vmatprep.subr.bf16.mxu0 %v760_v16  ;;  %v794_v25 = vpack.c.bf16 %v519_v22, %v518_v20  ;;  %v764_v26 = vpack.c.bf16 %v37_v24, %v36_v23  ;;  %v536_v27 = vld [vmem:[%s1358_s1 + $0x1a0] sm:$0xff]  ;;  %v537_v28 = vld [vmem:[%s1358_s1 + $0x1a8] sm:$0xff]  ;;  %v38_v35 = vld [vmem:[%s1358_s1 + $0xb0] sm:$0xff] }
   0x8   :  { %793 = vmatprep.subr.bf16.mxu1 %v792_v17  ;;  %v20_v29 = vld [vmem:[%s1358_s1 + $0x20] sm:$0xff]  ;;  %v796_v30 = vpack.c.bf16 %v537_v28, %v536_v27  ;;  %v21_v31 = vld [vmem:[%s1358_s1 + $0x28] sm:$0xff]  ;;  %v39_v36 = vld [vmem:[%s1358_s1 + $0xb8] sm:$0xff] }
   0x9   :  { %v520_v32 = vld [vmem:[%s1358_s1 + $0x120] sm:$0xff]  ;;  %v521_v33 = vld [vmem:[%s1358_s1 + $0x128] sm:$0xff]  ;;  %v766_v34 = vpack.c.bf16 %v21_v31, %v20_v29  ;;  %v538_v37 = vld [vmem:[%s1358_s1 + $0x1b0] sm:$0xff]  ;;  %v768_v39 = vpack.c.bf16 %v39_v36, %v38_v35 }
   0xa   :  { %763 = vmatpush3.bf16.msra.mxu0 %v762_v21  ;;  %v798_v38 = vpack.c.bf16 %v521_v33, %v520_v32  ;;  %v539_v40 = vld [vmem:[%s1358_s1 + $0x1b8] sm:$0xff]  ;;  %v22_v41 = vld [vmem:[%s1358_s1 + $0x30] sm:$0xff]  ;;  %v40_v46 = vld [vmem:[%s1358_s1 + $0xc0] sm:$0xff] }
   0xb   :  { %795 = vmatpush3.bf16.msra.mxu1 %v794_v25  ;;  %765 = vmatprep.subr.bf16.mxu0 %v764_v26  ;;  %v23_v42 = vld [vmem:[%s1358_s1 + $0x38] sm:$0xff]  ;;  %v800_v43 = vpack.c.bf16 %v539_v40, %v538_v37  ;;  %v522_v44 = vld [vmem:[%s1358_s1 + $0x130] sm:$0xff]  ;;  %v41_v47 = vld [vmem:[%s1358_s1 + $0xc8] sm:$0xff] }
   0xc   :  { %797 = vmatprep.subr.bf16.mxu1 %v796_v30  ;;  %v523_v45 = vld [vmem:[%s1358_s1 + $0x138] sm:$0xff]  ;;  %v540_v48 = vld [vmem:[%s1358_s1 + $0x1c0] sm:$0xff]  ;;  %v541_v49 = vld [vmem:[%s1358_s1 + $0x1c8] sm:$0xff]  ;;  %v770_v50 = vpack.c.bf16 %v23_v42, %v22_v41  ;;  %v772_v52 = vpack.c.bf16 %v41_v47, %v40_v46 }
   0xd   :  { %v802_v51 = vpack.c.bf16 %v523_v45, %v522_v44  ;;  %v24_v53 = vld [vmem:[%s1358_s1 + $0x40] sm:$0xff]  ;;  %v25_v54 = vld [vmem:[%s1358_s1 + $0x48] sm:$0xff]  ;;  %v804_v56 = vpack.c.bf16 %v541_v49, %v540_v48  ;;  %v42_v58 = vld [vmem:[%s1358_s1 + $0xd0] sm:$0xff] }
   0xe   :  { %767 = vmatpush3.bf16.msra.mxu0 %v766_v34  ;;  %v524_v55 = vld [vmem:[%s1358_s1 + $0x140] sm:$0xff]  ;;  %v525_v57 = vld [vmem:[%s1358_s1 + $0x148] sm:$0xff]  ;;  %v43_v59 = vld [vmem:[%s1358_s1 + $0xd8] sm:$0xff]  ;;  %v774_v62 = vpack.c.bf16 %v25_v54, %v24_v53 }
   0xf   :  { %799 = vmatpush3.bf16.msra.mxu1 %v798_v38  ;;  %769 = vmatprep.subr.bf16.mxu0 %v768_v39  ;;  %v542_v60 = vld [vmem:[%s1358_s1 + $0x1d0] sm:$0xff]  ;;  %v543_v61 = vld [vmem:[%s1358_s1 + $0x1d8] sm:$0xff]  ;;  %v806_v63 = vpack.c.bf16 %v525_v57, %v524_v55  ;;  %v776_v0 = vpack.c.bf16 %v43_v59, %v42_v58  ;;  %v44_v6 = vld [vmem:[%s1358_s1 + $0xe0] sm:$0xff] }
  0x10   :  { %801 = vmatprep.subr.bf16.mxu1 %v800_v43  ;;  %v26_v1 = vld [vmem:[%s1358_s1 + $0x50] sm:$0xff]  ;;  %v27_v2 = vld [vmem:[%s1358_s1 + $0x58] sm:$0xff]  ;;  %v808_v4 = vpack.c.bf16 %v543_v61, %v542_v60  ;;  %v45_v7 = vld [vmem:[%s1358_s1 + $0xe8] sm:$0xff] }
  0x11   :  { %v526_v3 = vld [vmem:[%s1358_s1 + $0x150] sm:$0xff]  ;;  %v527_v5 = vld [vmem:[%s1358_s1 + $0x158] sm:$0xff]  ;;  %v544_v8 = vld [vmem:[%s1358_s1 + $0x1e0] sm:$0xff]  ;;  %v778_v10 = vpack.c.bf16 %v27_v2, %v26_v1  ;;  %v780_v14 = vpack.c.bf16 %v45_v7, %v44_v6 }
  0x12   :  { %771 = vmatpush3.bf16.msra.mxu0 %v770_v50  ;;  %v545_v9 = vld [vmem:[%s1358_s1 + $0x1e8] sm:$0xff]  ;;  %v28_v11 = vld [vmem:[%s1358_s1 + $0x60] sm:$0xff]  ;;  %v810_v13 = vpack.c.bf16 %v527_v5, %v526_v3  ;;  %v46_v19 = vld [vmem:[%s1358_s1 + $0xf0] sm:$0xff] }
  0x13   :  { %803 = vmatpush3.bf16.msra.mxu1 %v802_v51  ;;  %773 = vmatprep.subr.bf16.mxu0 %v772_v52  ;;  %v29_v12 = vld [vmem:[%s1358_s1 + $0x68] sm:$0xff]  ;;  %v528_v15 = vld [vmem:[%s1358_s1 + $0x160] sm:$0xff]  ;;  %v812_v18 = vpack.c.bf16 %v545_v9, %v544_v8  ;;  %v47_v20 = vld [vmem:[%s1358_s1 + $0xf8] sm:$0xff] }
  0x14   :  { %805 = vmatprep.subr.bf16.mxu1 %v804_v56  ;;  %v529_v16 = vld [vmem:[%s1358_s1 + $0x168] sm:$0xff]  ;;  %v515_v17 = vld.sshfl [vmem:[%s1357_s0] sm:$0x33 pattern:$0x76325410]  ;;  %v546_v23 = vld [vmem:[%s1358_s1 + $0x1f0] sm:$0xff]  ;;  %v782_v26 = vpack.c.bf16 %v29_v12, %v28_v11  ;;  %v784_v28 = vpack.c.bf16 %v47_v20, %v46_v19 }
  0x15   :  { %v56_v21 = vcombine.high %v515_v17, %v515_v17  ;;  %v548_v22 = vld.sshfl [vmem:[%s1357_s0 + $0x4] sm:$0x33 pattern:$0x76325410]  ;;  %v547_v24 = vld [vmem:[%s1358_s1 + $0x1f8] sm:$0xff]  ;;  %v814_v27 = vpack.c.bf16 %v529_v16, %v528_v15  ;;  %v30_v29 = vld [vmem:[%s1358_s1 + $0x70] sm:$0xff] }
  0x16   :  { %775 = vmatpush3.bf16.msra.mxu0 %v774_v62  ;;  %v171_v25 = vcombine.high %v548_v22, %v548_v22  ;;  %v31_v30 = vld [vmem:[%s1358_s1 + $0x78] sm:$0xff]  ;;  %v530_v31 = vld [vmem:[%s1358_s1 + $0x170] sm:$0xff]  ;;  %v816_v32 = vpack.c.bf16 %v547_v24, %v546_v23  ;;  %v565_v34 = vld [vmem:[%s1358_s1 + $0x280] sm:$0xff] }
  0x17   :  { %807 = vmatpush3.bf16.msra.mxu1 %v806_v63  ;;  %777 = vmatprep.subr.bf16.mxu0 %v776_v0  ;;  %v531_v33 = vld [vmem:[%s1358_s1 + $0x178] sm:$0xff]  ;;  %v566_v35 = vld [vmem:[%s1358_s1 + $0x288] sm:$0xff]  ;;  %v598_v36 = vld [vmem:[%s1358_s1 + $0x380] sm:$0xff]  ;;  %v786_v38 = vpack.c.bf16 %v31_v30, %v30_v29 }
  0x18   :  { %809 = vmatprep.subr.bf16.mxu1 %v808_v4  ;;  %123 = vmatprep.mubr.f32.mxu0 %v56_v21  ;;  %v599_v37 = vld [vmem:[%s1358_s1 + $0x388] sm:$0xff]  ;;  %v818_v39 = vpack.c.bf16 %v531_v33, %v530_v31  ;;  %v820_v40 = vpack.c.bf16 %v566_v35, %v565_v34  ;;  %v549_v41 = vld [vmem:[%s1358_s1 + $0x200] sm:$0xff]  ;;  %v567_v46 = vld [vmem:[%s1358_s1 + $0x290] sm:$0xff] }
  0x19   :  { %238 = vmatprep.mubr.f32.mxu1 %v171_v25  ;;  %v550_v42 = vld [vmem:[%s1358_s1 + $0x208] sm:$0xff]  ;;  %v582_v43 = vld [vmem:[%s1358_s1 + $0x300] sm:$0xff]  ;;  %v852_v44 = vpack.c.bf16 %v599_v37, %v598_v36  ;;  %v568_v47 = vld [vmem:[%s1358_s1 + $0x298] sm:$0xff] }
  0x1a   :  { %779 = vmatpush3.bf16.msra.mxu0 %v778_v10  ;;  %v583_v45 = vld [vmem:[%s1358_s1 + $0x308] sm:$0xff]  ;;  %v600_v48 = vld [vmem:[%s1358_s1 + $0x390] sm:$0xff]  ;;  %v601_v49 = vld [vmem:[%s1358_s1 + $0x398] sm:$0xff]  ;;  %v822_v50 = vpack.c.bf16 %v550_v42, %v549_v41  ;;  %v824_v52 = vpack.c.bf16 %v568_v47, %v567_v46 }
  0x1b   :  { %811 = vmatpush3.bf16.msra.mxu1 %v810_v13  ;;  %781 = vmatprep.subr.bf16.mxu0 %v780_v14  ;;  %v854_v51 = vpack.c.bf16 %v583_v45, %v582_v43  ;;  %v551_v53 = vld [vmem:[%s1358_s1 + $0x210] sm:$0xff]  ;;  %v552_v54 = vld [vmem:[%s1358_s1 + $0x218] sm:$0xff]  ;;  %v856_v56 = vpack.c.bf16 %v601_v49, %v600_v48  ;;  %v569_v58 = vld [vmem:[%s1358_s1 + $0x2a0] sm:$0xff] }
  0x1c   :  { %813 = vmatprep.subr.bf16.mxu1 %v812_v18  ;;  %v584_v55 = vld [vmem:[%s1358_s1 + $0x310] sm:$0xff]  ;;  %v585_v57 = vld [vmem:[%s1358_s1 + $0x318] sm:$0xff]  ;;  %v570_v59 = vld [vmem:[%s1358_s1 + $0x2a8] sm:$0xff]  ;;  %v826_v62 = vpack.c.bf16 %v552_v54, %v551_v53 }
  0x1d   :  { %v602_v60 = vld [vmem:[%s1358_s1 + $0x3a0] sm:$0xff]  ;;  %v603_v61 = vld [vmem:[%s1358_s1 + $0x3a8] sm:$0xff]  ;;  %v858_v63 = vpack.c.bf16 %v585_v57, %v584_v55  ;;  %v828_v0 = vpack.c.bf16 %v570_v59, %v569_v58  ;;  %v571_v6 = vld [vmem:[%s1358_s1 + $0x2b0] sm:$0xff] }
  0x1e   :  { %783 = vmatpush3.bf16.msra.mxu0 %v782_v26  ;;  %v553_v1 = vld [vmem:[%s1358_s1 + $0x220] sm:$0xff]  ;;  %v554_v2 = vld [vmem:[%s1358_s1 + $0x228] sm:$0xff]  ;;  %v860_v4 = vpack.c.bf16 %v603_v61, %v602_v60  ;;  %v572_v7 = vld [vmem:[%s1358_s1 + $0x2b8] sm:$0xff] }
  0x1f   :  { %815 = vmatpush3.bf16.msra.mxu1 %v814_v27  ;;  %785 = vmatprep.subr.bf16.mxu0 %v784_v28  ;;  %v586_v3 = vld [vmem:[%s1358_s1 + $0x320] sm:$0xff]  ;;  %v587_v5 = vld [vmem:[%s1358_s1 + $0x328] sm:$0xff]  ;;  %v604_v8 = vld [vmem:[%s1358_s1 + $0x3b0] sm:$0xff]  ;;  %v830_v10 = vpack.c.bf16 %v554_v2, %v553_v1  ;;  %v832_v12 = vpack.c.bf16 %v572_v7, %v571_v6 }
  0x20   :  { %817 = vmatprep.subr.bf16.mxu1 %v816_v32  ;;  %v605_v9 = vld [vmem:[%s1358_s1 + $0x3b8] sm:$0xff]  ;;  %v862_v11 = vpack.c.bf16 %v587_v5, %v586_v3  ;;  %v555_v13 = vld [vmem:[%s1358_s1 + $0x230] sm:$0xff]  ;;  %v573_v18 = vld [vmem:[%s1358_s1 + $0x2c0] sm:$0xff] }
  0x21   :  { %v556_v14 = vld [vmem:[%s1358_s1 + $0x238] sm:$0xff]  ;;  %v588_v15 = vld [vmem:[%s1358_s1 + $0x330] sm:$0xff]  ;;  %v864_v16 = vpack.c.bf16 %v605_v9, %v604_v8  ;;  %v574_v19 = vld [vmem:[%s1358_s1 + $0x2c8] sm:$0xff] }
  0x22   :  { %787 = vmatpush3.bf16.msra.mxu0 %v786_v38  ;;  %v606_v20 = vld [vmem:[%s1358_s1 + $0x3c0] sm:$0xff]  ;;  %v607_v21 = vld [vmem:[%s1358_s1 + $0x3c8] sm:$0xff]  ;;  %v834_v23 = vpack.c.bf16 %v556_v14, %v555_v13 }
  0x23   :  { %819 = vmatpush3.bf16.msra.mxu1 %v818_v39  ;;  %821 = vmatprep.subr.bf16.mxu0 %v820_v40  ;;  %v1252_v25 = vld.sshfl [vmem:[%s1357_s0 + $0xc] sm:$0x33 pattern:$0x76325410] }
  0x24   :  { %853 = vmatprep.subr.bf16.mxu1 %v852_v44 }
  0x25   :  { %124 = vmatmul.mubr.f32.vlgmr.msra.gmra.mrb[0].mxu0 %v515_v17  ;;  %v589_v17 = vld [vmem:[%s1358_s1 + $0x338] sm:$0xff] }
  0x26   :  { %239 = vmatmul.mubr.f32.vlgmr.msra.gmra.mrb[0].mxu1 %v548_v22  ;;  %823 = vmatpush3.bf16.msra.mxu0 %v822_v50  ;;  %v1245_v22 = vld.sshfl [vmem:[%s1357_s0 + $0x8] sm:$0x33 pattern:$0x76325410] }
  0x27   :  { %855 = vmatpush3.bf16.msra.mxu1 %v854_v51  ;;  %825 = vmatprep.subr.bf16.mxu0 %v824_v52  ;;  %v286_v24 = vcombine.high %v1245_v22, %v1245_v22 }
  0x28   :  { %857 = vmatprep.subr.bf16.mxu1 %v856_v56 }
  0x2a   :  { %827 = vmatpush3.bf16.msra.mxu0 %v826_v62 }
  0x2b   :  { %859 = vmatpush3.bf16.msra.mxu1 %v858_v63  ;;  %829 = vmatprep.subr.bf16.mxu0 %v828_v0 }
  0x2c   :  { %861 = vmatprep.subr.bf16.mxu1 %v860_v4 }
  0x2e   :  { %831 = vmatpush3.bf16.msra.mxu0 %v830_v10 }
  0x2f   :  { %8 = vsyncpa [#allocation3], 0  ;;  %863 = vmatpush3.bf16.msra.mxu1 %v862_v11  ;;  %833 = vmatprep.subr.bf16.mxu0 %v832_v12  ;;  %v866_v26 = vpack.c.bf16 %v589_v17, %v588_v15  ;;  %v836_v27 = vpack.c.bf16 %v574_v19, %v573_v18  ;;  %v557_v28 = vld [vmem:[%s1358_s1 + $0x240] sm:$0xff]  ;;  %v558_v29 = vld [vmem:[%s1358_s1 + $0x248] sm:$0xff]  ;;  %v401_v31 = vcombine.high %v1252_v25, %v1252_v25  ;;  %s912_s4 = smov 32   ;;  %s914_s5 = smov 96  }
  0x30   :  { %v590_v30 = vld [vmem:[%s1358_s1 + $0x340] sm:$0xff]  ;;  %865 = vmatprep.subr.bf16.mxu1 %v864_v16  ;;  %v868_v32 = vpack.c.bf16 %v607_v21, %v606_v20  ;;  %v591_v33 = vld [vmem:[%s1358_s1 + $0x348] sm:$0xff]  ;;  %v575_v34 = vld [vmem:[%s1358_s1 + $0x2d0] sm:$0xff]  ;;  %353 = vmatprep.mubr.f32.mxu0 %v286_v24  ;;  %v838_v38 = vpack.c.bf16 %v558_v29, %v557_v28  ;;  %vm486_vm0 = vcmask 261120   ;;  %vm488_vm1 = vcmask 523264   ;;  %s915_s8 = smov [#allocation2]  }
  0x31   :  { %v576_v35 = vld [vmem:[%s1358_s1 + $0x2d8] sm:$0xff]  ;;  %v608_v36 = vld [vmem:[%s1358_s1 + $0x3d0] sm:$0xff]  ;;  %468 = vmatprep.mubr.f32.mxu1 %v401_v31  ;;  %v870_v39 = vpack.c.bf16 %v591_v33, %v590_v30  ;;  %v577_v46 = vld [vmem:[%s1358_s1 + $0x2e0] sm:$0xff]  ;;  %vm490_vm2 = vcmask 785408   ;;  %s507_s9 = sshll.u32 %s915_s8, 4  ;;  %s508_s9 = int_to_ptr.vmem [resolvable:$true] %s507_s9 }
  0x32   :  { %v609_v37 = vld [vmem:[%s1358_s1 + $0x3d8] sm:$0xff]  ;;  %835 = vmatpush3.bf16.msra.mxu0 %v834_v23  ;;  %v840_v40 = vpack.c.bf16 %v576_v35, %v575_v34  ;;  %v559_v41 = vld [vmem:[%s1358_s1 + $0x250] sm:$0xff]  ;;  %v578_v47 = vld [vmem:[%s1358_s1 + $0x2e8] sm:$0xff]  ;;  %s888_s0 = scalar_lea.vmem %s508_s9, 32  ;;  %p893_p1 = scmp.lt.s32.totalorder %s508_s9, %s508_s9 }
  0x33   :  { %867 = vmatpush3.bf16.msra.mxu1 %v866_v26  ;;  %837 = vmatprep.subr.bf16.mxu0 %v836_v27  ;;  %v560_v42 = vld [vmem:[%s1358_s1 + $0x258] sm:$0xff]  ;;  %v592_v43 = vld [vmem:[%s1358_s1 + $0x350] sm:$0xff]  ;;  %v872_v44 = vpack.c.bf16 %v609_v37, %v608_v36  ;;  %v610_v48 = vld [vmem:[%s1358_s1 + $0x3e0] sm:$0xff]  ;;  %v844_v52 = vpack.c.bf16 %v578_v47, %v577_v46  ;;  %p889_p0 = scmp.ne.s32.totalorder %s508_s9, %s888_s0  ;;  %p894_p2 = scmp.lt.s32.totalorder %s888_s0, %s888_s0 }
  0x34   :  { %869 = vmatprep.subr.bf16.mxu1 %v868_v32  ;;  %v593_v45 = vld [vmem:[%s1358_s1 + $0x358] sm:$0xff]  ;;  %v611_v49 = vld [vmem:[%s1358_s1 + $0x3e8] sm:$0xff]  ;;  %v842_v50 = vpack.c.bf16 %v560_v42, %v559_v41  ;;  %v561_v53 = vld [vmem:[%s1358_s1 + $0x260] sm:$0xff] }
  0x35   :  { %v874_v51 = vpack.c.bf16 %v593_v45, %v592_v43  ;;  %v562_v54 = vld [vmem:[%s1358_s1 + $0x268] sm:$0xff]  ;;  %v594_v55 = vld [vmem:[%s1358_s1 + $0x360] sm:$0xff]  ;;  %v876_v56 = vpack.c.bf16 %v611_v49, %v610_v48  ;;  %v579_v58 = vld [vmem:[%s1358_s1 + $0x2f0] sm:$0xff]  ;;  %p895_p3 = por %p894_p2, %p893_p1 }
  0x36   :  { %839 = vmatpush3.bf16.msra.mxu0 %v838_v38  ;;  %v595_v57 = vld [vmem:[%s1358_s1 + $0x368] sm:$0xff]  ;;  %v580_v59 = vld [vmem:[%s1358_s1 + $0x2f8] sm:$0xff]  ;;  %v612_v60 = vld [vmem:[%s1358_s1 + $0x3f0] sm:$0xff]  ;;  %v846_v62 = vpack.c.bf16 %v562_v54, %v561_v53 }
  0x37   :  { %871 = vmatpush3.bf16.msra.mxu1 %v870_v39  ;;  %841 = vmatprep.subr.bf16.mxu0 %v840_v40  ;;  %v613_v61 = vld [vmem:[%s1358_s1 + $0x3f8] sm:$0xff]  ;;  %v878_v63 = vpack.c.bf16 %v595_v57, %v594_v55  ;;  %v848_v0 = vpack.c.bf16 %v580_v59, %v579_v58  ;;  %v563_v1 = vld [vmem:[%s1358_s1 + $0x270] sm:$0xff]  ;;  %v615_v23 = vld [vmem:[%s1359_s2] ss:$0 sm:$0xff]  ;;  %p896_p4 = pnand %p895_p3, %p889_p0 }
  0x38   :  { %873 = vmatprep.subr.bf16.mxu1 %v872_v44  ;;  %v564_v2 = vld [vmem:[%s1358_s1 + $0x278] sm:$0xff]  ;;  %v880_v3 = vpack.c.bf16 %v613_v61, %v612_v60  ;;  %v596_v4 = vld [vmem:[%s1358_s1 + $0x370] sm:$0xff] }
  0x39   :  { %v597_v5 = vld [vmem:[%s1358_s1 + $0x378] sm:$0xff]  ;;  %v850_v6 = vpack.c.bf16 %v564_v2, %v563_v1  ;;  %s913_s1 = smov 64  }
  0x3a   :  { %843 = vmatpush3.bf16.msra.mxu0 %v842_v50  ;;  %v882_v7 = vpack.c.bf16 %v597_v5, %v596_v4 }
  0x3b   :  { %875 = vmatpush3.bf16.msra.mxu1 %v874_v51  ;;  %845 = vmatprep.subr.bf16.mxu0 %v844_v52 }
  0x3c   :  { %877 = vmatprep.subr.bf16.mxu1 %v876_v56 }
  0x3e   :  { %847 = vmatpush3.bf16.msra.mxu0 %v846_v62 }
  0x3f   :  { %879 = vmatpush3.bf16.msra.mxu1 %v878_v63  ;;  %849 = vmatprep.subr.bf16.mxu0 %v848_v0 }
  0x40   :  { %881 = vmatprep.subr.bf16.mxu1 %v880_v3 }
  0x42   :  { %851 = vmatpush3.bf16.msra.mxu0 %v850_v6 }
  0x43   :  { %883 = vmatpush3.bf16.msra.mxu1 %v882_v7 }
  0x45   :  { %354 = vmatmul.mubr.f32.vlgmr.msra.gmra.mrb[2].mxu0 %v1245_v22 }
  0x46   :  { %469 = vmatmul.mubr.f32.vlgmr.msra.gmra.mrb[2].mxu1 %v1252_v25 }
  0xf8   :  { %v648_v8 = vpop.f32.mrb[0].mxu0 }
  0xf9   :  { %v683_v9 = vpop.f32.mrb[0].mxu1  ;;  %v649_v10 = vpop.f32.mrb[1].mxu0 }
  0xfa   :  { %v650_v11 = vadd.f32 %v649_v10, %v648_v8  ;;  %v684_v12 = vpop.f32.mrb[1].mxu1 }
  0xfb   :  { %v685_v13 = vadd.f32 %v684_v12, %v683_v9 }
  0xfd   :  { %475 = vrot.lane.b32.xlu0 %v685_v13, %s912_s4 }
 0x118   :  { %v718_v14 = vpop.f32.mrb[2].mxu0 }
 0x119   :  { %v753_v15 = vpop.f32.mrb[2].mxu1  ;;  %v719_v16 = vpop.f32.mrb[3].mxu0 }
 0x11a   :  { %v720_v17 = vadd.f32 %v719_v16, %v718_v14  ;;  %v754_v18 = vpop.f32.mrb[3].mxu1 }
 0x11b   :  { %v755_v19 = vadd.f32 %v754_v18, %v753_v15 }
 0x11c   :  { %479 = vrot.lane.b32.xlu0 %v720_v17, %s913_s1 }
 0x11d   :  { %483 = vrot.lane.b32.xlu1 %v755_v19, %s914_s5 }
 0x16f   :  { %v476_v20 = vpop.permute.xlu0 %475 }
 0x170   :  { %v487_v21 = vsel %vm486_vm0, %v650_v11, %v476_v20 }
 0x18e   :  { %v480_v22 = vpop.permute.xlu0 %479 }
 0x18f   :  { %v484_v24 = vpop.permute.xlu1 %483  ;;  %v489_v25 = vsel %vm488_vm1, %v487_v21, %v480_v22 }
 0x190   :  { %v491_v26 = vsel %vm490_vm2, %v489_v25, %v484_v24 }
 0x191   :  { %v499_v27 = vadd.f32 %v615_v23, %v491_v26 }
 0x193   :  { %500 = vst [vmem:[#allocation2] sm:$0x3] %v499_v27 }
 0x194   :  { %899 = shalt.err (!%p896_p4)
}
 0x195   :  { %s900_s12 = scalar_lea.hbm %s1360_s3, 32 }
 0x196   :  { %p901_p5 = scmp.ne.s32.totalorder %s1360_s3, %s900_s12  ;;  %p904_p6 = scmp.lt.u32.totalorder %s900_s12, %s1360_s3 }
 0x198   :  { %p906_p7 = pnand %p904_p6, %p901_p5 }
 0x19a   :  { %909 = shalt.err (!%p906_p7)
}
 0x19b   :  { %510 = dma.vmem_to_hbm [thread:$0]  %s508_s9, 32, %s1360_s3, [#allocation3]  }
 0x19c   :  { %910 = dma.done.wait [#allocation3], 32  }
 0x19d   :  { %911 = vsyncadd [#allocation3], 4294967264 }
 0x19e   :  { %514 = vsyncpa [#allocation3], 1 }

</bundles_post_ra>
